<compile_context>
chip_gen: v7x
topology: tpu7x:2x2x1
jax: 0.10.0
libtpu: 0.0.40
codegen_flags: <defaults>
</compile_context>

<pallas_src>
import jax
import jax.numpy as jnp
from jax.experimental import pallas as pl
from jax.experimental.pallas import tpu as pltpu

LANE = 128
SUBLANE = 8


def _round_up(x, m):
    return ((x + m - 1) // m) * m


def linear_kernel(w_ref, x_ref, o_ref):
    # w_ref: (Din,) f32 in SMEM (weight scalars, broadcast for free)
    # x_ref: (Din, TR, 128) f32 in VMEM (dense slabs: batch on lanes+sublanes)
    # o_ref: (TR, 128) f32 in VMEM (dense, unmasked stores)
    din = x_ref.shape[0]
    acc = w_ref[0] * x_ref[0]
    for f in range(1, din):                 # Din == 3 -> fully unrolled VPU MACs
        acc = acc + w_ref[f] * x_ref[f]
    o_ref[...] = acc.astype(o_ref.dtype)


def linear_forward(x, weight, *, row_groups_per_tile=2048, min_pallas_batch=4096):
    """Bias-free Linear(3 -> 1).  x: (B, 3), weight: (1, 3) -> (B, 1)."""
    B, Din = x.shape
    Dout = weight.shape[0]                  # == 1
    w = weight.astype(x.dtype)

    # Small-batch fast path: XLA's fused matmul reads x once in natural layout
    # and is strictly faster than any Pallas launch at these sizes.
    if B < min_pallas_batch:
        return x @ w.T

    # --- layout plumbing (wrapper side, not compute) -------------------------
    Bp = _round_up(B, LANE)
    xT = x.T                                               # (3, B)
    if Bp != B:
        xT = jnp.pad(xT, ((0, 0), (0, Bp - B)))            # (3, Bp)
    n_groups = Bp // LANE
    x3 = xT.reshape(Din, n_groups, LANE)                   # free row-major view

    # --- tile sizing: big tiles, but keep grid >= 2 for v7x's two TCs --------
    if n_groups <= SUBLANE:
        tr = n_groups                                      # single full block
    else:
        tr = min(row_groups_per_tile,
                 _round_up(pl.cdiv(n_groups, 2), SUBLANE))
    grid = (pl.cdiv(n_groups, tr),)

    y = pl.pallas_call(
        linear_kernel,
        out_shape=jax.ShapeDtypeStruct((n_groups, LANE), x.dtype),
        grid=grid,
        in_specs=[
            pl.BlockSpec(memory_space=pltpu.MemorySpace.SMEM),     # weight (3,)
            pl.BlockSpec((Din, tr, LANE), lambda i: (0, i, 0)),    # dense input
        ],
        out_specs=pl.BlockSpec((tr, LANE), lambda i: (i, 0)),      # dense output
        compiler_params=pltpu.CompilerParams(
            dimension_semantics=("parallel",),
            vmem_limit_bytes=32 * 1024 * 1024,
        ),
        cost_estimate=pl.CostEstimate(
            flops=(2 * Din - 1) * B,
            transcendentals=0,
            bytes_accessed=(Din + Dout) * 4 * B,
        ),
    )(w.reshape(-1), x3)

    # Drop padded lanes (they never feed a kept output) and restore (B, 1).
    return y.reshape(-1)[:B].reshape(B, Dout)


if __name__ == "__main__":
    key = jax.random.PRNGKey(0)
    kx, kw, kx2, kx3 = jax.random.split(key, 4)

    # PyTorch-layout weight for Linear(3, 1): (out_features, in_features)
    weight = jax.random.uniform(kw, (1, 3), dtype=jnp.float32,
                                minval=-1.0, maxval=1.0)

    # 1) Small shape consistent with the module (batch=8): force the Pallas
    #    path once so the kernel itself is exercised at small shapes.
    x = jax.random.normal(kx, (8, 3), dtype=jnp.float32)
    out = jax.block_until_ready(linear_forward(x, weight, min_pallas_batch=0))
    ref = x @ weight.T
    assert out.shape == (8, 1)
    assert jnp.allclose(out, ref, atol=1e-5, rtol=1e-5), "mismatch (B=8, pallas)"

    # 1b) Same shape through the default small-batch XLA fast path.
    out_fast = jax.block_until_ready(linear_forward(x, weight))
    assert jnp.allclose(out_fast, ref, atol=1e-5, rtol=1e-5), "mismatch (B=8, fast path)"

    # 2) Non-aligned mid-size batch: exercises lane padding, a >=2-tile grid
    #    and a partial trailing block.
    x2 = jax.random.normal(kx2, (40000, 3), dtype=jnp.float32)
    out2 = jax.block_until_ready(linear_forward(x2, weight))
    ref2 = x2 @ weight.T
    assert out2.shape == (40000, 1)
    assert jnp.allclose(out2, ref2, atol=1e-5, rtol=1e-5), "mismatch (B=40000)"

    # 3) Large batch: exercises the full 256K-elements-per-step tiles.
    x3 = jax.random.normal(kx3, (1 << 20, 3), dtype=jnp.float32)
    out3 = jax.block_until_ready(linear_forward(x3, weight))
    ref3 = x3 @ weight.T
    assert out3.shape == (1 << 20, 1)
    assert jnp.allclose(out3, ref3, atol=1e-5, rtol=1e-5), "mismatch (B=1M)"

    print("KERNEL_OK")
</pallas_src>

<mosaic_0001>
module attributes {stable_mosaic.version = 11 : i64} {
  func.func @linear_kernel(%arg0: i32, %arg1: memref<3xf32, #tpu.memory_space<smem>>, %arg2: memref<3x1x128xf32, #tpu.memory_space<vmem>>, %arg3: memref<1x128xf32, #tpu.memory_space<vmem>>) attributes {dimension_semantics = [#tpu.dimension_semantics<parallel>], iteration_bounds = array<i64: 1>, scalar_prefetch = 0 : i64, scratch_operands = 0 : i64, tpu.core_type = #tpu.core_type<tc>, window_params = [{transform_indices = @transform_0, window_bounds = array<i64: 3>}, {transform_indices = @transform_1, window_bounds = array<i64: 3, 1, 128>}, {transform_indices = @transform_2, window_bounds = array<i64: 1, 128>}]} {
    %c0 = arith.constant 0 : index
    %0 = memref.load %arg1[%c0] : memref<3xf32, #tpu.memory_space<smem>>
    %c0_0 = arith.constant 0 : index
    %c0_1 = arith.constant 0 : index
    %c0_2 = arith.constant 0 : index
    %1 = vector.load %arg2[%c0_0, %c0_1, %c0_2] : memref<3x1x128xf32, #tpu.memory_space<vmem>>, vector<1x1x128xf32>
    %2 = vector.shape_cast %1 : vector<1x1x128xf32> to vector<1x128xf32>
    %3 = vector.broadcast %0 : f32 to vector<1x128xf32>
    %4 = arith.mulf %3, %2 : vector<1x128xf32>
    %c1 = arith.constant 1 : index
    %5 = memref.load %arg1[%c1] : memref<3xf32, #tpu.memory_space<smem>>
    %c1_3 = arith.constant 1 : index
    %c0_4 = arith.constant 0 : index
    %c0_5 = arith.constant 0 : index
    %6 = vector.load %arg2[%c1_3, %c0_4, %c0_5] : memref<3x1x128xf32, #tpu.memory_space<vmem>>, vector<1x1x128xf32>
    %7 = vector.shape_cast %6 : vector<1x1x128xf32> to vector<1x128xf32>
    %8 = vector.broadcast %5 : f32 to vector<1x128xf32>
    %9 = arith.mulf %8, %7 : vector<1x128xf32>
    %10 = arith.addf %4, %9 : vector<1x128xf32>
    %c2 = arith.constant 2 : index
    %11 = memref.load %arg1[%c2] : memref<3xf32, #tpu.memory_space<smem>>
    %c2_6 = arith.constant 2 : index
    %c0_7 = arith.constant 0 : index
    %c0_8 = arith.constant 0 : index
    %12 = vector.load %arg2[%c2_6, %c0_7, %c0_8] : memref<3x1x128xf32, #tpu.memory_space<vmem>>, vector<1x1x128xf32>
    %13 = vector.shape_cast %12 : vector<1x1x128xf32> to vector<1x128xf32>
    %14 = vector.broadcast %11 : f32 to vector<1x128xf32>
    %15 = arith.mulf %14, %13 : vector<1x128xf32>
    %16 = arith.addf %10, %15 : vector<1x128xf32>
    %c0_9 = arith.constant 0 : index
    %c0_10 = arith.constant 0 : index
    %17 = vector.load %arg3[%c0_9, %c0_10] : memref<1x128xf32, #tpu.memory_space<vmem>>, vector<1x128xf32>
    tpu.vector_store %arg3[%c0_9, %c0_10], %16 {strides = array<i32>} : memref<1x128xf32, #tpu.memory_space<vmem>>, vector<1x128xf32>,
    return
  }
  func.func @transform_0(%arg0: i32) -> i32 {
    %c0_i32 = arith.constant 0 : i32
    %c0_i32_0 = arith.constant 0 : i32
    return %c0_i32 : i32
  }
  func.func @transform_1(%arg0: i32) -> (i32, i32, i32) {
    %c0_i32 = arith.constant 0 : i32
    %c0_i32_0 = arith.constant 0 : i32
    %c0_i32_1 = arith.constant 0 : i32
    return %c0_i32, %arg0, %c0_i32_0 : i32, i32, i32
  }
  func.func @transform_2(%arg0: i32) -> (i32, i32) {
    %c0_i32 = arith.constant 0 : i32
    %c0_i32_0 = arith.constant 0 : i32
    return %arg0, %c0_i32 : i32, i32
  }
}

</mosaic_0001>

<bundles_post_ra>
// kernel: tpu_custom_call.1
= control target key start
LH: loop header
LB: loop body
LE: loop exit
PB: predicated region body
PF: predicated region fallthrough
CT: control target
= control target key end

     0   :  { %7 = vsyncpa [#allocation4], 0  ;;  %s147_s0 = inlined_call_operand.hbm [shape: f32[3], index: 0, kind: input, shape index: {}]   ;;  %s148_s1 = inlined_call_operand.vmem [shape: f32[3,1,128], index: 1, kind: input, shape index: {}]   ;;  %s149_s2 = inlined_call_operand.hbm [shape: f32[1,128], index: 2, kind: output, shape index: {}]  }
   0x1   :  { %8 = vsyncpa [#allocation3], 0  ;;  %s61_s11 = scalar_lea.hbm %s147_s0, 16 }
   0x2   :  { %p62_p0 = scmp.ne.s32.totalorder %s147_s0, %s61_s11  ;;  %p65_p1 = scmp.lt.u32.totalorder %s61_s11, %s147_s0 }
   0x4   :  { %p67_p2 = pnand %p65_p1, %p62_p0 }
   0x6   :  { %70 = shalt.err (!%p67_p2)
}
   0x7   :  { %s97_s16 = smov [#allocation2]  }
   0x8   :  { %16 = dma.hbm_to_smem %s147_s0, 16, %s97_s16, [#allocation4]  }
   0x9   :  { %93 = dma.done.wait [#allocation4], 16  }
   0xa   :  { %94 = vsyncadd [#allocation4], 4294967280 }
   0xb   :  { %22 = sfence }
   0xc   :  { %s23_s19 = sld [smem:[#allocation2]]  ;;  %s55_s20 = sld [smem:[#allocation2 + $0x1]]  ;;  %v24_v0 = vld [vmem:[%s148_s1] sm:$0x1]  ;;  %v56_v1 = vld [vmem:[%s148_s1 + $0x1] sm:$0x1] }
   0xd   :  { %s57_s21 = sld [smem:[#allocation2 + $0x2]]  ;;  %v58_v2 = vld [vmem:[%s148_s1 + $0x2] sm:$0x1]  ;;  %s98_s0 = smov [#allocation5]  }
   0xe   :  { %s46_s28 = sshll.u32 %s98_s0, 4  ;;  %s47_s28 = int_to_ptr.vmem [resolvable:$true] %s46_s28 }
   0xf   :  { %s71_s29 = scalar_lea.vmem %s47_s28, 16  ;;  %s75_s30 = scalar_lea.vmem %s47_s28, 32 }
  0x10   :  { %p72_p3 = scmp.ne.s32.totalorder %s47_s28, %s71_s29  ;;  %p76_p4 = scmp.lt.s32.totalorder %s47_s28, %s47_s28 }
  0x11   :  { %p77_p5 = scmp.lt.s32.totalorder %s75_s30, %s71_s29 }
  0x12   :  { %v25_v3 = vstv %s23_s19  ;;  %v30_v4 = vstv %s55_s20 }
  0x13   :  { %v26_v5 = vmul.f32 %v25_v3, %v24_v0  ;;  %v31_v6 = vmul.f32 %v56_v1, %v30_v4  ;;  %v36_v7 = vstv %s57_s21  ;;  %p78_p6 = por %p77_p5, %p76_p4 }
  0x14   :  { %v37_v8 = vmul.f32 %v58_v2, %v36_v7 }
  0x15   :  { %v32_v9 = vadd.f32 %v31_v6, %v26_v5  ;;  %p79_p7 = pnand %p78_p6, %p72_p3 }
  0x17   :  { %v38_v10 = vadd.f32 %v37_v8, %v32_v9 }
  0x19   :  { %39 = vst [vmem:[#allocation5] sm:$0x1] %v38_v10 }
  0x1a   :  { %82 = shalt.err (!%p79_p7)
}
  0x1b   :  { %s83_s4 = scalar_lea.hbm %s149_s2, 16 }
  0x1c   :  { %p84_p8 = scmp.ne.s32.totalorder %s149_s2, %s83_s4  ;;  %p87_p9 = scmp.lt.u32.totalorder %s83_s4, %s149_s2 }
  0x1e   :  { %p89_p10 = pnand %p87_p9, %p84_p8 }
  0x20   :  { %92 = shalt.err (!%p89_p10)
}
  0x21   :  { %49 = dma.vmem_to_hbm [thread:$0]  %s47_s28, 16, %s149_s2, [#allocation3]  }
  0x22   :  { %95 = dma.done.wait [#allocation3], 16  }
  0x23   :  { %96 = vsyncadd [#allocation3], 4294967280 }
  0x24   :  { %53 = vsyncpa [#allocation3], 1 }
  0x25   :  { %54 = vsyncpa [#allocation4], 1 }

</bundles_post_ra>
